<compile_context>
chip_gen: v5e
topology: v5e:2x2
jax: 0.10.0
libtpu: 0.0.40
codegen_flags: <defaults>
</compile_context>

<pallas_src>
import functools
import math

import jax
import jax.numpy as jnp
from jax.experimental import pallas as pl
from jax.experimental.pallas import tpu as pltpu

EPS = 1e-5                       # PyTorch nn.LayerNorm default
NEG_INF = -1e9                   # matches the usual masked_fill(-1e9) reference
VMEM_LIMIT = 64 * 1024 * 1024    # v5e/v6e: 128 MiB physical, v7x: 64 MiB physical


def _tile(dim, target, align=8):
    """Largest `align`-multiple divisor of dim that is <= target.
    Falls back to the full dim (always legal) only if no aligned divisor exists."""
    if dim <= target:
        return dim
    t = (min(target, dim) // align) * align
    while t >= align:
        if dim % t == 0:
            return t
        t -= align
    return dim


def _cparams(dims):
    return pltpu.CompilerParams(dimension_semantics=dims,
                                vmem_limit_bytes=VMEM_LIMIT)


# --------------------- Tiled matmul + bias (+ ReLU) kernel -------------------
def _matmul_bias_kernel(x_ref, w_ref, b_ref, o_ref, acc_ref, *, relu):
    k = pl.program_id(2)

    @pl.when(k == 0)
    def _():
        acc_ref[...] = jnp.zeros_like(acc_ref)

    acc_ref[...] += jnp.dot(x_ref[...], w_ref[...],
                            preferred_element_type=jnp.float32)

    @pl.when(k == pl.num_programs(2) - 1)
    def _():
        y = acc_ref[...] + b_ref[...].astype(jnp.float32)
        if relu:
            y = jnp.maximum(y, 0.0)
        o_ref[...] = y.astype(o_ref.dtype)


def linear(x, w, b, relu=False, tm=256, tn=512, tk=512):
    M, K = x.shape
    N = w.shape[1]
    tm, tn, tk = _tile(M, tm, 8), _tile(N, tn, 128), _tile(K, tk, 128)
    return pl.pallas_call(
        functools.partial(_matmul_bias_kernel, relu=relu),
        out_shape=jax.ShapeDtypeStruct((M, N), x.dtype),
        grid_spec=pltpu.PrefetchScalarGridSpec(
            num_scalar_prefetch=0,
            grid=(M // tm, N // tn, K // tk),
            in_specs=[
                pl.BlockSpec((tm, tk), lambda i, j, k: (i, k)),
                pl.BlockSpec((tk, tn), lambda i, j, k: (k, j)),
                pl.BlockSpec((1, tn), lambda i, j, k: (0, j)),
            ],
            out_specs=pl.BlockSpec((tm, tn), lambda i, j, k: (i, j)),
            scratch_shapes=[pltpu.VMEM((tm, tn), jnp.float32)],
        ),
        compiler_params=_cparams(("parallel", "parallel", "arbitrary")),
    )(x, w, b.reshape(1, N))


# ------------- Tiled matmul + bias + residual + LayerNorm epilogue -----------
def _matmul_res_ln_kernel(x_ref, w_ref, b_ref, r_ref, g_ref, beta_ref,
                          o_ref, acc_ref):
    k = pl.program_id(1)

    @pl.when(k == 0)
    def _():
        acc_ref[...] = jnp.zeros_like(acc_ref)

    acc_ref[...] += jnp.dot(x_ref[...], w_ref[...],
                            preferred_element_type=jnp.float32)

    @pl.when(k == pl.num_programs(1) - 1)
    def _():
        y = (acc_ref[...] + b_ref[...].astype(jnp.float32)
             + r_ref[...].astype(jnp.float32))
        mu = jnp.mean(y, axis=-1, keepdims=True)
        var = jnp.mean((y - mu) ** 2, axis=-1, keepdims=True)
        yn = (y - mu) * jax.lax.rsqrt(var + EPS)
        o_ref[...] = (yn * g_ref[...] + beta_ref[...]).astype(o_ref.dtype)


def linear_residual_ln(x, w, b, residual, gamma, beta, tm=256, tk=512):
    M, K = x.shape
    N = w.shape[1]                 # LN needs the full output row -> N untiled
    tm, tk = _tile(M, tm, 8), _tile(K, tk, 128)
    return pl.pallas_call(
        _matmul_res_ln_kernel,
        out_shape=jax.ShapeDtypeStruct((M, N), x.dtype),
        grid_spec=pltpu.PrefetchScalarGridSpec(
            num_scalar_prefetch=0,
            grid=(M // tm, K // tk),
            in_specs=[
                pl.BlockSpec((tm, tk), lambda i, k: (i, k)),
                pl.BlockSpec((tk, N), lambda i, k: (k, 0)),
                pl.BlockSpec((1, N), lambda i, k: (0, 0)),
                pl.BlockSpec((tm, N), lambda i, k: (i, 0)),
                pl.BlockSpec((1, N), lambda i, k: (0, 0)),
                pl.BlockSpec((1, N), lambda i, k: (0, 0)),
            ],
            out_specs=pl.BlockSpec((tm, N), lambda i, k: (i, 0)),
            scratch_shapes=[pltpu.VMEM((tm, N), jnp.float32)],
        ),
        compiler_params=_cparams(("parallel", "arbitrary")),
    )(x, w, b.reshape(1, N), residual, gamma.reshape(1, N), beta.reshape(1, N))


# -------- Fused FFN (w1 -> ReLU -> w2, d_ff tiled) + residual + LayerNorm ----
def _ffn_res_ln_kernel(x_ref, w1_ref, b1_ref, w2_ref, b2_ref, g_ref, beta_ref,
                       o_ref, acc_ref):
    f = pl.program_id(1)

    @pl.when(f == 0)
    def _():
        acc_ref[...] = jnp.zeros_like(acc_ref)

    x = x_ref[...]                                     # (tm, D), grid-invariant over f
    h = jnp.dot(x, w1_ref[...], preferred_element_type=jnp.float32)   # (tm, tf)
    h = jnp.maximum(h + b1_ref[...].astype(jnp.float32), 0.0)
    acc_ref[...] += jnp.dot(h.astype(w2_ref.dtype), w2_ref[...],
                            preferred_element_type=jnp.float32)       # (tm, D)

    @pl.when(f == pl.num_programs(1) - 1)
    def _():
        y = (acc_ref[...] + b2_ref[...].astype(jnp.float32)
             + x.astype(jnp.float32))
        mu = jnp.mean(y, axis=-1, keepdims=True)
        var = jnp.mean((y - mu) ** 2, axis=-1, keepdims=True)
        yn = (y - mu) * jax.lax.rsqrt(var + EPS)
        o_ref[...] = (yn * g_ref[...] + beta_ref[...]).astype(o_ref.dtype)


def ffn_residual_ln(x, w1, b1, w2, b2, gamma, beta, tm=256, tf=512):
    M, D = x.shape
    dff = w1.shape[1]
    tm = _tile(M, tm, 8)
    tf = _tile(dff, tf, 128)
    return pl.pallas_call(
        _ffn_res_ln_kernel,
        out_shape=jax.ShapeDtypeStruct((M, D), x.dtype),
        grid_spec=pltpu.PrefetchScalarGridSpec(
            num_scalar_prefetch=0,
            grid=(M // tm, dff // tf),
            in_specs=[
                pl.BlockSpec((tm, D), lambda i, f: (i, 0)),
                pl.BlockSpec((D, tf), lambda i, f: (0, f)),
                pl.BlockSpec((1, tf), lambda i, f: (0, f)),
                pl.BlockSpec((tf, D), lambda i, f: (f, 0)),
                pl.BlockSpec((1, D), lambda i, f: (0, 0)),
                pl.BlockSpec((1, D), lambda i, f: (0, 0)),
                pl.BlockSpec((1, D), lambda i, f: (0, 0)),
            ],
            out_specs=pl.BlockSpec((tm, D), lambda i, f: (i, 0)),
            scratch_shapes=[pltpu.VMEM((tm, D), jnp.float32)],
        ),
        compiler_params=_cparams(("parallel", "arbitrary")),
    )(x, w1, b1.reshape(1, dff), w2, b2.reshape(1, D),
      gamma.reshape(1, D), beta.reshape(1, D))


# --------------------------- Final LayerNorm (no residual) -------------------
def _ln_kernel(x_ref, g_ref, b_ref, o_ref):
    x = x_ref[...].astype(jnp.float32)
    mu = jnp.mean(x, axis=-1, keepdims=True)
    var = jnp.mean((x - mu) ** 2, axis=-1, keepdims=True)
    o_ref[...] = ((x - mu) * jax.lax.rsqrt(var + EPS) * g_ref[...]
                  + b_ref[...]).astype(o_ref.dtype)


def layernorm(x, gamma, beta, tm=512, out_dtype=None):
    M, D = x.shape
    tm = _tile(M, tm, 8)
    out_dtype = out_dtype or x.dtype
    return pl.pallas_call(
        _ln_kernel,
        out_shape=jax.ShapeDtypeStruct((M, D), out_dtype),
        grid_spec=pltpu.PrefetchScalarGridSpec(
            num_scalar_prefetch=0,
            grid=(M // tm,),
            in_specs=[pl.BlockSpec((tm, D), lambda i: (i, 0)),
                      pl.BlockSpec((1, D), lambda i: (0, 0)),
                      pl.BlockSpec((1, D), lambda i: (0, 0))],
            out_specs=pl.BlockSpec((tm, D), lambda i: (i, 0)),
        ),
        compiler_params=_cparams(("parallel",)),
    )(x, gamma.reshape(1, D), beta.reshape(1, D))


# ------------------- Flash attention (online softmax) kernel -----------------
def _flash_kernel(*refs, causal, has_bias, tq, tk):
    if has_bias:
        q_ref, k_ref, v_ref, bias_ref, o_ref, m_sc, l_sc, acc_sc = refs
    else:
        q_ref, k_ref, v_ref, o_ref, m_sc, l_sc, acc_sc = refs
        bias_ref = None
    qi = pl.program_id(1)
    ki = pl.program_id(2)

    @pl.when(ki == 0)
    def _():
        m_sc[...] = jnp.full_like(m_sc, -jnp.inf)
        l_sc[...] = jnp.zeros_like(l_sc)
        acc_sc[...] = jnp.zeros_like(acc_sc)

    def compute():
        q = q_ref[0]                      # (tq, Dh) bf16; 1/sqrt(Dh) folded into Wq
        k = k_ref[0]                      # (tk, Dh) bf16
        s = jax.lax.dot_general(q, k, (((1,), (1,)), ((), ())),
                                preferred_element_type=jnp.float32)   # (tq, tk) f32
        if has_bias:
            s = s + bias_ref[0].astype(jnp.float32)       # additive 0 / -1e9 bias
        if causal:
            # Mask generated in-kernel: no mask DMA at all.
            q_ids = qi * tq + jax.lax.broadcasted_iota(jnp.int32, (tq, tk), 0)
            k_ids = ki * tk + jax.lax.broadcasted_iota(jnp.int32, (tq, tk), 1)
            s = jnp.where(q_ids >= k_ids, s, NEG_INF)

        m_prev = m_sc[...]
        m_new = jnp.maximum(m_prev, jnp.max(s, axis=-1, keepdims=True))
        alpha = jnp.exp(m_prev - m_new)
        p = jnp.exp(s - m_new)
        l_sc[...] = alpha * l_sc[...] + jnp.sum(p, axis=-1, keepdims=True)
        acc_sc[...] = alpha * acc_sc[...] + jnp.dot(
            p.astype(v_ref.dtype), v_ref[0], preferred_element_type=jnp.float32)
        m_sc[...] = m_new

    if causal:
        # Skip KV blocks that lie entirely above the diagonal (fully masked).
        pl.when(ki * tk <= qi * tq + (tq - 1))(compute)
    else:
        compute()

    @pl.when(ki == pl.num_programs(2) - 1)
    def _():
        o_ref[0] = (acc_sc[...]
                    * pl.reciprocal(l_sc[...], approx=True)).astype(o_ref.dtype)


def _normalize_mask_bias(mask, B, H, Sq, Sk):
    """Compact bf16 additive bias (0 / -1e9) plus its flash index_map.
    Never materializes (B*H, Sq, Sk) unless a true per-head mask was supplied."""
    m = jnp.asarray(mask)
    while m.ndim < 4:
        m = m[None]
    bm, hm = m.shape[0], m.shape[1]
    bias = jnp.where(m > 0, 0.0, NEG_INF).astype(jnp.bfloat16)
    if hm == 1:
        bias3 = jnp.broadcast_to(bias, (bm, 1, Sq, Sk)).reshape(bm, Sq, Sk)
        if bm == 1:
            index_map = lambda b, qi, ki: (0, qi, ki)
        else:  # per-batch padding mask, shared across heads
            index_map = lambda b, qi, ki: (b // H, qi, ki)
    else:  # per-head mask (rare) -> full broadcast
        bias3 = jnp.broadcast_to(bias, (B, H, Sq, Sk)).reshape(B * H, Sq, Sk)
        index_map = lambda b, qi, ki: (b, qi, ki)
    return bias3, index_map


def flash_attention(q, k, v, mask, B, H, tq=512, tk=512):
    """q/k/v: (B*H, S, Dh).  mask: None | 'causal' | array broadcastable to (B,H,Sq,Sk).
    Note: a fully-masked query row yields a uniform average over keys, matching the
    usual masked_fill(-1e9) + softmax reference behavior."""
    BH, Sq, Dh = q.shape
    Sk = k.shape[1]
    causal = isinstance(mask, str) and mask == "causal"
    has_bias = (mask is not None) and not causal

    tq = _tile(Sq, tq, 8)
    tk = _tile(Sk, tk, 128 if has_bias else 8)   # bias block lane dim needs 128-align

    in_specs = [
        pl.BlockSpec((1, tq, Dh), lambda b, qi, ki: (b, qi, 0)),
        pl.BlockSpec((1, tk, Dh), lambda b, qi, ki: (b, ki, 0)),
        pl.BlockSpec((1, tk, Dh), lambda b, qi, ki: (b, ki, 0)),
    ]
    inputs = [q, k, v]
    if has_bias:
        bias3, bias_map = _normalize_mask_bias(mask, B, H, Sq, Sk)
        in_specs.append(pl.BlockSpec((1, tq, tk), bias_map))
        inputs.append(bias3)

    return pl.pallas_call(
        functools.partial(_flash_kernel, causal=causal, has_bias=has_bias,
                          tq=tq, tk=tk),
        out_shape=jax.ShapeDtypeStruct((BH, Sq, Dh), q.dtype),
        grid_spec=pltpu.PrefetchScalarGridSpec(
            num_scalar_prefetch=0,
            grid=(BH, Sq // tq, Sk // tk),
            in_specs=in_specs,
            out_specs=pl.BlockSpec((1, tq, Dh), lambda b, qi, ki: (b, qi, 0)),
            scratch_shapes=[
                pltpu.VMEM((tq, 1), jnp.float32),   # running max
                pltpu.VMEM((tq, 1), jnp.float32),   # running sum
                pltpu.VMEM((tq, Dh), jnp.float32),  # output accumulator
            ],
        ),
        compiler_params=_cparams(("parallel", "parallel", "arbitrary")),
    )(*inputs)


# ----------------------------- Model plumbing --------------------------------
def init_params(key, vocab_size, d_model, num_layers, num_heads, d_ff):
    keys = jax.random.split(key, 1 + num_layers)
    params = {
        "embedding": jax.random.normal(keys[0], (vocab_size, d_model), jnp.float32),
        "layers": [],
        "final_ln_g": jnp.ones((d_model,), jnp.float32),
        "final_ln_b": jnp.zeros((d_model,), jnp.float32),
    }

    def lin(k, fi, fo):
        # bf16 weight storage: halves HBM/VMEM bytes; MXU still accumulates in f32.
        return (jax.random.normal(k, (fi, fo), jnp.float32) * 0.02).astype(jnp.bfloat16)

    for li in range(num_layers):
        lk = jax.random.split(keys[1 + li], 7)
        layer = {
            # self-attention: fused QKV projection + output projection
            "sa_wqkv": lin(lk[0], d_model, 3 * d_model),
            "sa_bqkv": jnp.zeros((3 * d_model,), jnp.float32),
            "sa_wo": lin(lk[1], d_model, d_model),
            "sa_bo": jnp.zeros((d_model,), jnp.float32),
            # cross-attention: Q from x, fused KV from encoder output
            "ca_wq": lin(lk[2], d_model, d_model),
            "ca_bq": jnp.zeros((d_model,), jnp.float32),
            "ca_wkv": lin(lk[3], d_model, 2 * d_model),
            "ca_bkv": jnp.zeros((2 * d_model,), jnp.float32),
            "ca_wo": lin(lk[4], d_model, d_model),
            "ca_bo": jnp.zeros((d_model,), jnp.float32),
            # feed-forward
            "ff_w1": lin(lk[5], d_model, d_ff),
            "ff_b1": jnp.zeros((d_ff,), jnp.float32),
            "ff_w2": lin(lk[6], d_ff, d_model),
            "ff_b2": jnp.zeros((d_model,), jnp.float32),
            # layer norms (kept f32)
            "ln1_g": jnp.ones((d_model,), jnp.float32), "ln1_b": jnp.zeros((d_model,), jnp.float32),
            "ln2_g": jnp.ones((d_model,), jnp.float32), "ln2_b": jnp.zeros((d_model,), jnp.float32),
            "ln3_g": jnp.ones((d_model,), jnp.float32), "ln3_b": jnp.zeros((d_model,), jnp.float32),
        }
        params["layers"].append(layer)
    return params


def _split_heads(t2d, B, S, H, Dh):
    # XLA glue: (B*S, D) -> (B*H, S, Dh).  TODO(synk): fold into flash BlockSpecs.
    return t2d.reshape(B, S, H, Dh).transpose(0, 2, 1, 3).reshape(B * H, S, Dh)


def _merge_heads(t, B, S, H, Dh):
    # XLA glue: (B*H, S, Dh) -> (B*S, D)
    return t.reshape(B, H, S, Dh).transpose(0, 2, 1, 3).reshape(B * S, H * Dh)


def decoder_forward(params, tgt, enc_output, src_mask=None, tgt_mask=None,
                    *, num_heads):
    """tgt_mask / src_mask: None, the string 'causal', or an array broadcastable to
    (B, H, Sq, Sk) (1 = keep, 0 = masked), same convention as the PyTorch reference."""
    B, S = tgt.shape
    D = params["embedding"].shape[1]
    H = num_heads
    Dh = D // H
    S_enc = enc_output.shape[1]
    scale = 1.0 / math.sqrt(Dh)

    # Embedding lookup (XLA gather glue); compute in bf16, accumulate in f32.
    x2d = jnp.take(params["embedding"], tgt, axis=0).reshape(B * S, D)
    x2d = x2d.astype(jnp.bfloat16)
    enc2d = enc_output.reshape(B * S_enc, D).astype(jnp.bfloat16)

    for lp in params["layers"]:
        # Fold the 1/sqrt(Dh) attention scale into the Q projection weights/bias
        # (tiny XLA ops; constant-folded under jit) so the flash kernel has no
        # per-block scale multiply.
        sa_wqkv = lp["sa_wqkv"].at[:, :D].multiply(scale)
        sa_bqkv = lp["sa_bqkv"].at[:D].multiply(scale)
        ca_wq = lp["ca_wq"] * scale
        ca_bq = lp["ca_bq"] * scale

        # 1) masked self-attention: fused QKV -> flash -> fused proj + res + LN
        qkv = linear(x2d, sa_wqkv, sa_bqkv)
        qh = _split_heads(qkv[:, :D], B, S, H, Dh)
        kh = _split_heads(qkv[:, D:2 * D], B, S, H, Dh)
        vh = _split_heads(qkv[:, 2 * D:], B, S, H, Dh)
        attn = flash_attention(qh, kh, vh, tgt_mask, B, H)
        attn2d = _merge_heads(attn, B, S, H, Dh)
        x2d = linear_residual_ln(attn2d, lp["sa_wo"], lp["sa_bo"],
                                 x2d, lp["ln1_g"], lp["ln1_b"])

        # 2) cross-attention over encoder output
        q2d = linear(x2d, ca_wq, ca_bq)
        kv = linear(enc2d, lp["ca_wkv"], lp["ca_bkv"])
        qh = _split_heads(q2d, B, S, H, Dh)
        kh = _split_heads(kv[:, :D], B, S_enc, H, Dh)
        vh = _split_heads(kv[:, D:], B, S_enc, H, Dh)
        attn = flash_attention(qh, kh, vh, src_mask, B, H)
        attn2d = _merge_heads(attn, B, S, H, Dh)
        x2d = linear_residual_ln(attn2d, lp["ca_wo"], lp["ca_bo"],
                                 x2d, lp["ln2_g"], lp["ln2_b"])

        # 3) fused position-wise FFN (d_ff tiled) + residual + LN
        x2d = ffn_residual_ln(x2d, lp["ff_w1"], lp["ff_b1"],
                              lp["ff_w2"], lp["ff_b2"],
                              lp["ln3_g"], lp["ln3_b"])

    # final LayerNorm (no residual), cast back to f32 for the returned tensor
    x2d = layernorm(x2d, params["final_ln_g"], params["final_ln_b"],
                    out_dtype=jnp.float32)
    return x2d.reshape(B, S, D)


if __name__ == "__main__":
    vocab_size, d_model, num_layers, num_heads, d_ff = 50, 32, 2, 4, 64
    B, S = 2, 8

    root = jax.random.PRNGKey(0)
    kp, kt, ke = jax.random.split(root, 3)

    params = init_params(kp, vocab_size, d_model, num_layers, num_heads, d_ff)
    tgt = jax.random.randint(kt, (B, S), 0, vocab_size)                 # (B, S) token ids
    enc_output = jax.random.normal(ke, (B, S, d_model), jnp.float32)    # (B, S, D)

    # 'causal' == torch.tril(ones(S, S)) target mask, generated in-kernel (no DMA).
    out = decoder_forward(params, tgt, enc_output,
                          src_mask=None, tgt_mask="causal",
                          num_heads=num_heads)
    out = jax.block_until_ready(out)

    assert out.shape == (B, S, d_model), out.shape
    assert bool(jnp.all(jnp.isfinite(out)))
    print("KERNEL_OK")
</pallas_src>

<mosaic_0001>
module attributes {stable_mosaic.version = 11 : i64} {
  func.func @_matmul_bias_kernel(%arg0: i32, %arg1: i32, %arg2: i32, %arg3: memref<16x32xbf16, #tpu.memory_space<vmem>>, %arg4: memref<32x96xbf16, #tpu.memory_space<vmem>>, %arg5: memref<1x96xf32, #tpu.memory_space<vmem>>, %arg6: memref<16x96xbf16, #tpu.memory_space<vmem>>, %arg7: memref<16x96xf32, #tpu.memory_space<vmem>>) attributes {dimension_semantics = [#tpu.dimension_semantics<parallel>, #tpu.dimension_semantics<parallel>, #tpu.dimension_semantics<arbitrary>], iteration_bounds = array<i64: 1, 1, 1>, scalar_prefetch = 0 : i64, scratch_operands = 1 : i64, tpu.core_type = #tpu.core_type<tc>, window_params = [{transform_indices = @transform_0, window_bounds = array<i64: 16, 32>}, {transform_indices = @transform_1, window_bounds = array<i64: 32, 96>}, {transform_indices = @transform_2, window_bounds = array<i64: 1, 96>}, {transform_indices = @transform_3, window_bounds = array<i64: 16, 96>}]} {
    %c0_i32 = arith.constant 0 : i32
    %0 = arith.cmpi eq, %arg2, %c0_i32 : i32
    %1 = arith.extui %0 : i1 to i32
    %c0_i32_0 = arith.constant 0 : i32
    %2 = arith.cmpi ne, %1, %c0_i32_0 : i32
    scf.if %2 {
      %cst_10 = arith.constant 0.000000e+00 : f32
      %12 = vector.broadcast %cst_10 : f32 to vector<16x96xf32>
      %c0_11 = arith.constant 0 : index
      %c0_12 = arith.constant 0 : index
      %13 = vector.load %arg7[%c0_11, %c0_12] : memref<16x96xf32, #tpu.memory_space<vmem>>, vector<16x96xf32>
      tpu.vector_store %arg7[%c0_11, %c0_12], %12 {strides = array<i32>} : memref<16x96xf32, #tpu.memory_space<vmem>>, vector<16x96xf32>,
    } else {
    }
    %c0 = arith.constant 0 : index
    %c0_1 = arith.constant 0 : index
    %3 = vector.load %arg7[%c0, %c0_1] : memref<16x96xf32, #tpu.memory_space<vmem>>, vector<16x96xf32>
    %c0_2 = arith.constant 0 : index
    %c0_3 = arith.constant 0 : index
    %4 = vector.load %arg3[%c0_2, %c0_3] : memref<16x32xbf16, #tpu.memory_space<vmem>>, vector<16x32xbf16>
    %c0_4 = arith.constant 0 : index
    %c0_5 = arith.constant 0 : index
    %5 = vector.load %arg4[%c0_4, %c0_5] : memref<32x96xbf16, #tpu.memory_space<vmem>>, vector<32x96xbf16>
    %cst = arith.constant dense<0.000000e+00> : vector<16x96xf32>
    %6 = tpu.matmul %4, %5, %cst {dimension_numbers = #tpu.dot_dimension_numbers<[1], [0], [0], [1], [0, 0, 1, 1], [], []>} : vector<16x32xbf16>, vector<32x96xbf16>, vector<16x96xf32> -> vector<16x96xf32>
    %7 = arith.addf %3, %6 : vector<16x96xf32>
    %c0_6 = arith.constant 0 : index
    %c0_7 = arith.constant 0 : index
    %8 = vector.load %arg7[%c0_6, %c0_7] : memref<16x96xf32, #tpu.memory_space<vmem>>, vector<16x96xf32>
    tpu.vector_store %arg7[%c0_6, %c0_7], %7 {strides = array<i32>} : memref<16x96xf32, #tpu.memory_space<vmem>>, vector<16x96xf32>,
    %c0_i32_8 = arith.constant 0 : i32
    %9 = arith.cmpi eq, %arg2, %c0_i32_8 : i32
    %10 = arith.extui %9 : i1 to i32
    %c0_i32_9 = arith.constant 0 : i32
    %11 = arith.cmpi ne, %10, %c0_i32_9 : i32
    scf.if %11 {
      %c0_10 = arith.constant 0 : index
      %c0_11 = arith.constant 0 : index
      %12 = vector.load %arg7[%c0_10, %c0_11] : memref<16x96xf32, #tpu.memory_space<vmem>>, vector<16x96xf32>
      %c0_12 = arith.constant 0 : index
      %c0_13 = arith.constant 0 : index
      %13 = vector.load %arg5[%c0_12, %c0_13] : memref<1x96xf32, #tpu.memory_space<vmem>>, vector<1x96xf32>
      %14 = vector.broadcast %13 : vector<1x96xf32> to vector<16x96xf32>
      %15 = arith.addf %12, %14 : vector<16x96xf32>
      %16 = arith.truncf %15 : vector<16x96xf32> to vector<16x96xbf16>
      %c0_14 = arith.constant 0 : index
      %c0_15 = arith.constant 0 : index
      %17 = vector.load %arg6[%c0_14, %c0_15] : memref<16x96xbf16, #tpu.memory_space<vmem>>, vector<16x96xbf16>
      tpu.vector_store %arg6[%c0_14, %c0_15], %16 {strides = array<i32>} : memref<16x96xbf16, #tpu.memory_space<vmem>>, vector<16x96xbf16>,
    } else {
    }
    return
  }
  func.func @transform_0(%arg0: i32, %arg1: i32, %arg2: i32) -> (i32, i32) {
    %c0_i32 = arith.constant 0 : i32
    return %arg0, %arg2 : i32, i32
  }
  func.func @transform_1(%arg0: i32, %arg1: i32, %arg2: i32) -> (i32, i32) {
    %c0_i32 = arith.constant 0 : i32
    return %arg2, %arg1 : i32, i32
  }
  func.func @transform_2(%arg0: i32, %arg1: i32, %arg2: i32) -> (i32, i32) {
    %c0_i32 = arith.constant 0 : i32
    %c0_i32_0 = arith.constant 0 : i32
    return %c0_i32, %arg1 : i32, i32
  }
  func.func @transform_3(%arg0: i32, %arg1: i32, %arg2: i32) -> (i32, i32) {
    %c0_i32 = arith.constant 0 : i32
    return %arg0, %arg1 : i32, i32
  }
}

</mosaic_0001>

<bundles_post_ra>
// kernel: tpu_custom_call.1
= control target key start
LH: loop header
LB: loop body
LE: loop exit
PB: predicated region body
PF: predicated region fallthrough
CT: control target
= control target key end

     0   :  { %8 = vsyncpa [#allocation4], 0  ;;  %s291_s0 = inlined_call_operand.hbm [shape: bf16[16,32], index: 0, kind: input, shape index: {}]   ;;  %s292_s1 = inlined_call_operand.hbm [shape: bf16[32,96], index: 1, kind: input, shape index: {}]   ;;  %s293_s2 = inlined_call_operand.vmem [shape: f32[1,96], index: 2, kind: input, shape index: {}]   ;;  %s294_s3 = inlined_call_operand.hbm [shape: bf16[16,96], index: 3, kind: output, shape index: {}]  }
   0x1   :  { %9 = vsyncpa [#allocation7], 0 }
   0x2   :  { %10 = vsyncpa [#allocation5], 0  ;;  %s15_s14 = sshll.u32 %s291_s0, 4  ;;  %s240_s15 = smov [#allocation3]   ;;  %s16_s14 = int_to_ptr.hbm [resolvable:$true] %s15_s14 }
   0x3   :  { %s17_s16 = sshll.u32 %s240_s15, 4  ;;  %s28_s19 = sshll.u32 %s292_s1, 4  ;;  %s18_s16 = int_to_ptr.vmem [resolvable:$true] %s17_s16  ;;  %s29_s19 = int_to_ptr.hbm [resolvable:$true] %s28_s19 }
   0x4   :  { %s241_s20 = smov 64   ;;  %s242_s21 = smov 4  }
   0x5   :  { %23 = dma.hbm_to_vmem [thread:$0]  %s16_s14, 128, %s18_s16, [#allocation4], %s241_s20, %s241_s20, %s242_s21  }
   0x6   :  { %s243_s22 = smov [#allocation6]  }
   0x7   :  { %s30_s23 = sshll.u32 %s243_s22, 4  ;;  %s31_s23 = int_to_ptr.vmem [resolvable:$true] %s30_s23 }
   0x8   :  { %36 = dma.hbm_to_vmem [thread:$0]  %s29_s19, 256, %s31_s23, [#allocation7], %s241_s20, %s241_s20, %s242_s21  }
   0x9   :  { %234 = dma.done.wait [#allocation4], 128  }
   0xa   :  { %235 = vsyncadd [#allocation4], 4294967168 }
   0xb   :  { %236 = dma.done.wait [#allocation7], 256  }
   0xc   :  { %237 = vsyncadd [#allocation7], 4294967040  ;;  %vm52_vm0 = vcmask 785408   ;;  %v244_v0 = vmov 0.0   ;;  %v154_v1 = vld [vmem:[#allocation6 + $0x8] sm:$0xff]  ;;  %v153_v2 = vld [vmem:[#allocation6] sm:$0xff] }
   0xd   :  { %53 = vst.msk [vmem:[#allocation2] sm:$0xff] %vm52_vm0, %v244_v0  ;;  %90 = vmatpush.bf16.msra.mxu0 %v154_v1  ;;  %v152_v3 = vld [vmem:[#allocation3] sm:$0xff]  ;;  %vm80_vm1 = vcmask 261120   ;;  %v161_v8 = vld [vmem:[%s293_s2] ss:$0 sm:$0xff]  ;;  %vm116_vm2 = vcmask 781312  }
   0xe   :  { %54 = vst.msk [vmem:[#allocation2 + $0x8] sm:$0xff] %vm52_vm0, %v244_v0  ;;  %s245_s24 = smov [#allocation8]   ;;  %s125_s28 = sshll.u32 %s294_s3, 4  ;;  %s126_s28 = int_to_ptr.hbm [resolvable:$true] %s125_s28 }
   0xf   :  { %s123_s25 = sshll.u32 %s245_s24, 4  ;;  %s124_s25 = int_to_ptr.vmem [resolvable:$true] %s123_s25 }
  0x11   :  { %91 = vmatpush.bf16.msra.mxu0 %v153_v2 }
  0x14   :  { %151 = vmatmul.msk.bf16.vlgmr.msra.gmra.mxu0 %vm80_vm1, %v152_v3  ;;  %v55_v4 = vld [vmem:[#allocation2] sm:$0xff] }
  0x15   :  { %v56_v7 = vld [vmem:[#allocation2 + $0x8] sm:$0xff] }
  0x91   :  { %v93_v5 = vpop.f32.mrf.mxu0 }
  0x92   :  { %v98_v6 = vadd.f32 %v93_v5, %v55_v4 }
  0x94   :  { %101 = vst.msk [vmem:[#allocation2] sm:$0xff] %vm52_vm0, %v98_v6 }
  0x99   :  { %v95_v9 = vpop.f32.mrf.mxu0 }
  0x9a   :  { %v99_v10 = vadd.f32 %v95_v9, %v56_v7 }
  0x9b   :  { %v106_v11 = vld [vmem:[#allocation2] sm:$0xff] }
  0x9c   :  { %102 = vst.msk [vmem:[#allocation2 + $0x8] sm:$0xff] %vm52_vm0, %v99_v10  ;;  %v112_v12 = vadd.f32 %v161_v8, %v106_v11 }
  0x9e   :  { %v114_v13 = vpack.c.bf16 %v112_v12, %v112_v12 }
  0xa0   :  { %117 = vst.msk [vmem:[#allocation8] sm:$0xf] %vm116_vm2, %v114_v13 }
  0xa3   :  { %v107_v14 = vld [vmem:[#allocation2 + $0x8] sm:$0xff] }
  0xa4   :  { %v113_v15 = vadd.f32 %v161_v8, %v107_v14 }
  0xa6   :  { %v115_v16 = vpack.c.bf16 %v113_v15, %v113_v15 }
  0xa8   :  { %118 = vst.msk [vmem:[#allocation8 + $0x4] sm:$0xf] %vm116_vm2, %v115_v16 }
  0xa9   :  { %131 = dma.vmem_to_hbm [thread:$0]  %s124_s25, 128, %s126_s28, [#allocation5], %s241_s20, %s241_s20, %s242_s21  }
  0xaa   :  { %238 = dma.done.wait [#allocation5], 128  }
  0xab   :  { %239 = vsyncadd [#allocation5], 4294967168 }
  0xac   :  { %136 = vsyncpa [#allocation4], 1 }
  0xad   :  { %137 = vsyncpa [#allocation7], 1 }
  0xae   :  { %138 = vsyncpa [#allocation5], 1 }

</bundles_post_ra>
